<compile_context>
chip_gen: v7x
topology: tpu7x:2x2x1
jax: 0.10.0
libtpu: 0.0.40
codegen_flags: <defaults>
</compile_context>

<pallas_src>
import jax
import jax.numpy as jnp
from jax.experimental import pallas as pl
from jax.experimental.pallas import tpu as pltpu


def _actor_kernel(x_ref,
                  w01_ref, b01_ref,                       # fused [fc1 ; residual]
                  g1_ref, bt1_ref,
                  w2_ref, b2_ref, g2_ref, bt2_ref,
                  w3_ref, b3_ref, g3_ref, bt3_ref,
                  w4_ref, b4_ref,
                  o_ref):
    hidden = g1_ref.shape[0]

    def linear(w_ref, v, b_ref):
        # [out, in] @ [in, batch] -> [out, batch]; f32 accumulation on the MXU.
        return jnp.dot(w_ref[...], v.astype(w_ref.dtype),
                       preferred_element_type=jnp.float32) + b_ref[...]

    def layernorm(v, g_ref, b_ref, eps=1e-5):
        # Features on axis 0 (sublanes); one-pass mean / mean-of-squares.
        mu = jnp.mean(v, axis=0, keepdims=True)
        var = jnp.mean(v * v, axis=0, keepdims=True) - mu * mu
        inv = jax.lax.rsqrt(var + eps)
        return (v - mu) * inv * g_ref[...] + b_ref[...]

    x = x_ref[...]                                    # [obs, bb]

    # One fused matmul produces both fc1 and the residual pre-activations.
    h01 = linear(w01_ref, x, b01_ref)                 # [2H, bb], f32
    residual = jnp.maximum(h01[hidden:, :], 0.0)      # relu(residual(x))

    # TODO(synk): dropout (p=0.2) omitted — eval-mode (identity) semantics.
    h = jnp.maximum(layernorm(h01[:hidden, :], g1_ref, bt1_ref), 0.0)
    h = jnp.maximum(layernorm(linear(w2_ref, h, b2_ref), g2_ref, bt2_ref), 0.0)
    h = jnp.maximum(layernorm(linear(w3_ref, h, b3_ref), g3_ref, bt3_ref), 0.0)

    h = h + residual
    o_ref[...] = jnp.tanh(linear(w4_ref, h, b4_ref)).astype(o_ref.dtype)


def _round_up(n, m):
    return (n + m - 1) // m * m


def prepare_params(p, mxu_dtype=jnp.bfloat16):
    """Repack [in,out] weights / [1,out] vectors into the kernel layout:
    weights [out, in] (cast to mxu_dtype), vectors [out, 1] (f32)."""
    def col(v):
        return v.reshape(-1, 1).astype(jnp.float32)

    w01 = jnp.concatenate([p["w1"].T, p["wr"].T], axis=0).astype(mxu_dtype)
    b01 = jnp.concatenate([p["b1"], p["br"]], axis=1).reshape(-1, 1)
    return dict(
        w01=w01, b01=b01.astype(jnp.float32),
        g1=col(p["g1"]), bt1=col(p["bt1"]),
        w2=p["w2"].T.astype(mxu_dtype), b2=col(p["b2"]),
        g2=col(p["g2"]), bt2=col(p["bt2"]),
        w3=p["w3"].T.astype(mxu_dtype), b3=col(p["b3"]),
        g3=col(p["g3"]), bt3=col(p["bt3"]),
        w4=p["w4"].T.astype(mxu_dtype), b4=col(p["b4"]),
    )


def actor_forward(x, params, *, block_batch=512, mxu_dtype=jnp.bfloat16):
    """x: [B, obs_dim] float32.  Returns tanh actions [B, act_dim].

    block_batch is the batch tile (rounded up to a multiple of 128).  On v7x
    choose block_batch ≈ B/(2k) so the grid is >= 2 and both TCs are used.
    """
    B, obs_dim = x.shape
    pp = prepare_params(params, mxu_dtype)
    hidden_dim = pp["g1"].shape[0]
    act_dim = pp["w4"].shape[0]

    # Batch tile: multiple of 128 (lane width); pad batch to a tile multiple.
    bb = _round_up(min(block_batch, _round_up(B, 128)), 128)
    b_pad = _round_up(B, bb)
    grid = pl.cdiv(b_pad, bb)

    # [features, batch] layout: batch sits on the lane axis / MXU N-dim.
    x_t = jnp.pad(x, ((0, b_pad - B), (0, 0))).T.astype(mxu_dtype)

    def full(shape):
        # Whole-array block, same for every grid step (weights stay resident).
        return pl.BlockSpec(shape, lambda i: (0, 0))

    in_specs = [
        pl.BlockSpec((obs_dim, bb), lambda i: (0, i)),               # x_t
        full((2 * hidden_dim, obs_dim)), full((2 * hidden_dim, 1)),  # fc1|res
        full((hidden_dim, 1)), full((hidden_dim, 1)),                # ln1
        full((hidden_dim, hidden_dim)), full((hidden_dim, 1)),       # fc2
        full((hidden_dim, 1)), full((hidden_dim, 1)),                # ln2
        full((hidden_dim, hidden_dim)), full((hidden_dim, 1)),       # fc3
        full((hidden_dim, 1)), full((hidden_dim, 1)),                # ln3
        full((act_dim, hidden_dim)), full((act_dim, 1)),             # fc4
    ]

    grid_spec = pltpu.PrefetchScalarGridSpec(
        num_scalar_prefetch=0,
        grid=(grid,),
        in_specs=in_specs,
        out_specs=pl.BlockSpec((act_dim, bb), lambda i: (0, i)),
    )

    fn = pl.pallas_call(
        _actor_kernel,
        out_shape=jax.ShapeDtypeStruct((act_dim, b_pad), jnp.float32),
        grid_spec=grid_spec,
        compiler_params=pltpu.CompilerParams(
            dimension_semantics=("parallel",)),
    )

    out_t = fn(x_t,
               pp["w01"], pp["b01"], pp["g1"], pp["bt1"],
               pp["w2"], pp["b2"], pp["g2"], pp["bt2"],
               pp["w3"], pp["b3"], pp["g3"], pp["bt3"],
               pp["w4"], pp["b4"])
    # [act, B_pad] -> [B, act]; drop the zero-padded batch columns.
    return out_t.T[:B].astype(x.dtype)


def init_params(key, obs_dim, act_dim, hidden_dim):
    """Deterministic synthetic parameters (PyTorch layout transposed to [in, out])."""
    ks = jax.random.split(key, 10)

    def lin(kw, kb, fan_in, fan_out):
        bound = 1.0 / jnp.sqrt(fan_in)
        w = jax.random.uniform(kw, (fan_in, fan_out), jnp.float32, -bound, bound)
        b = jax.random.uniform(kb, (1, fan_out), jnp.float32, -bound, bound)
        return w, b

    wr, br = lin(ks[0], ks[1], obs_dim, hidden_dim)
    w1, b1 = lin(ks[2], ks[3], obs_dim, hidden_dim)
    w2, b2 = lin(ks[4], ks[5], hidden_dim, hidden_dim)
    w3, b3 = lin(ks[6], ks[7], hidden_dim, hidden_dim)
    w4, b4 = lin(ks[8], ks[9], hidden_dim, act_dim)

    ones = jnp.ones((1, hidden_dim), jnp.float32)
    zeros = jnp.zeros((1, hidden_dim), jnp.float32)
    return dict(
        wr=wr, br=br,
        w1=w1, b1=b1, g1=ones, bt1=zeros,
        w2=w2, b2=b2, g2=ones, bt2=zeros,
        w3=w3, b3=b3, g3=ones, bt3=zeros,
        w4=w4, b4=b4,
    )


def actor_reference(x, p):
    """Pure-JAX f32 reference mirroring the PyTorch forward (eval mode)."""
    def ln(v, g, b, eps=1e-5):
        mu = jnp.mean(v, -1, keepdims=True)
        var = jnp.mean((v - mu) ** 2, -1, keepdims=True)
        return (v - mu) / jnp.sqrt(var + eps) * g + b

    residual = jax.nn.relu(x @ p["wr"] + p["br"])
    h = jax.nn.relu(ln(x @ p["w1"] + p["b1"], p["g1"], p["bt1"]))
    h = jax.nn.relu(ln(h @ p["w2"] + p["b2"], p["g2"], p["bt2"]))
    h = jax.nn.relu(ln(h @ p["w3"] + p["b3"], p["g3"], p["bt3"]))
    h = h + residual
    return jnp.tanh(h @ p["w4"] + p["b4"])


if __name__ == "__main__":
    obs_dim, act_dim, hidden_dim = 16, 8, 32
    batch = 16

    key = jax.random.PRNGKey(0)
    kx, kp = jax.random.split(key)
    x = jax.random.normal(kx, (batch, obs_dim), jnp.float32)
    params = init_params(kp, obs_dim, act_dim, hidden_dim)

    ref = actor_reference(x, params)

    # Exact-dtype path (f32 MXU inputs): must match the f32 reference tightly.
    out_f32 = jax.block_until_ready(
        actor_forward(x, params, block_batch=256, mxu_dtype=jnp.float32))
    assert out_f32.shape == (batch, act_dim)
    assert jnp.allclose(out_f32, ref, atol=1e-4, rtol=1e-4), "f32 mismatch vs reference"

    # Fast path (bf16 MXU inputs, f32 accumulation): looser tolerance.
    out_bf16 = jax.block_until_ready(
        actor_forward(x, params, block_batch=256, mxu_dtype=jnp.bfloat16))
    assert out_bf16.shape == (batch, act_dim)
    assert jnp.allclose(out_bf16, ref, atol=5e-2, rtol=5e-2), "bf16 mismatch vs reference"

    print("KERNEL_OK")
</pallas_src>

<mosaic_0001>
module attributes {stable_mosaic.version = 11 : i64} {
  func.func @_actor_kernel(%arg0: i32, %arg1: memref<16x128xf32, #tpu.memory_space<vmem>>, %arg2: memref<64x16xf32, #tpu.memory_space<vmem>>, %arg3: memref<64x1xf32, #tpu.memory_space<vmem>>, %arg4: memref<32x1xf32, #tpu.memory_space<vmem>>, %arg5: memref<32x1xf32, #tpu.memory_space<vmem>>, %arg6: memref<32x32xf32, #tpu.memory_space<vmem>>, %arg7: memref<32x1xf32, #tpu.memory_space<vmem>>, %arg8: memref<32x1xf32, #tpu.memory_space<vmem>>, %arg9: memref<32x1xf32, #tpu.memory_space<vmem>>, %arg10: memref<32x32xf32, #tpu.memory_space<vmem>>, %arg11: memref<32x1xf32, #tpu.memory_space<vmem>>, %arg12: memref<32x1xf32, #tpu.memory_space<vmem>>, %arg13: memref<32x1xf32, #tpu.memory_space<vmem>>, %arg14: memref<8x32xf32, #tpu.memory_space<vmem>>, %arg15: memref<8x1xf32, #tpu.memory_space<vmem>>, %arg16: memref<8x128xf32, #tpu.memory_space<vmem>>) attributes {dimension_semantics = [#tpu.dimension_semantics<parallel>], iteration_bounds = array<i64: 1>, scalar_prefetch = 0 : i64, scratch_operands = 0 : i64, tpu.core_type = #tpu.core_type<tc>, window_params = [{transform_indices = @transform_0, window_bounds = array<i64: 16, 128>}, {pipeline_mode = #tpu.pipeline_mode<synchronous>, transform_indices = @transform_1, window_bounds = array<i64: 64, 16>}, {pipeline_mode = #tpu.pipeline_mode<synchronous>, transform_indices = @transform_2, window_bounds = array<i64: 64, 1>}, {pipeline_mode = #tpu.pipeline_mode<synchronous>, transform_indices = @transform_3, window_bounds = array<i64: 32, 1>}, {pipeline_mode = #tpu.pipeline_mode<synchronous>, transform_indices = @transform_4, window_bounds = array<i64: 32, 1>}, {pipeline_mode = #tpu.pipeline_mode<synchronous>, transform_indices = @transform_5, window_bounds = array<i64: 32, 32>}, {pipeline_mode = #tpu.pipeline_mode<synchronous>, transform_indices = @transform_6, window_bounds = array<i64: 32, 1>}, {pipeline_mode = #tpu.pipeline_mode<synchronous>, transform_indices = @transform_7, window_bounds = array<i64: 32, 1>}, {pipeline_mode = #tpu.pipeline_mode<synchronous>, transform_indices = @transform_8, window_bounds = array<i64: 32, 1>}, {pipeline_mode = #tpu.pipeline_mode<synchronous>, transform_indices = @transform_9, window_bounds = array<i64: 32, 32>}, {pipeline_mode = #tpu.pipeline_mode<synchronous>, transform_indices = @transform_10, window_bounds = array<i64: 32, 1>}, {pipeline_mode = #tpu.pipeline_mode<synchronous>, transform_indices = @transform_11, window_bounds = array<i64: 32, 1>}, {pipeline_mode = #tpu.pipeline_mode<synchronous>, transform_indices = @transform_12, window_bounds = array<i64: 32, 1>}, {pipeline_mode = #tpu.pipeline_mode<synchronous>, transform_indices = @transform_13, window_bounds = array<i64: 8, 32>}, {pipeline_mode = #tpu.pipeline_mode<synchronous>, transform_indices = @transform_14, window_bounds = array<i64: 8, 1>}, {transform_indices = @transform_15, window_bounds = array<i64: 8, 128>}]} {
    %c0 = arith.constant 0 : index
    %c0_0 = arith.constant 0 : index
    %0 = vector.load %arg1[%c0, %c0_0] : memref<16x128xf32, #tpu.memory_space<vmem>>, vector<16x128xf32>
    %c0_1 = arith.constant 0 : index
    %c0_2 = arith.constant 0 : index
    %1 = vector.load %arg2[%c0_1, %c0_2] : memref<64x16xf32, #tpu.memory_space<vmem>>, vector<64x16xf32>
    %cst = arith.constant dense<0.000000e+00> : vector<64x128xf32>
    %2 = tpu.matmul %1, %0, %cst {dimension_numbers = #tpu.dot_dimension_numbers<[1], [0], [0], [1], [0, 0, 1, 1], [], []>} : vector<64x16xf32>, vector<16x128xf32>, vector<64x128xf32> -> vector<64x128xf32>
    %c0_3 = arith.constant 0 : index
    %c0_4 = arith.constant 0 : index
    %3 = vector.load %arg3[%c0_3, %c0_4] : memref<64x1xf32, #tpu.memory_space<vmem>>, vector<64x1xf32>
    %4 = vector.broadcast %3 : vector<64x1xf32> to vector<64x128xf32>
    %5 = arith.addf %2, %4 : vector<64x128xf32>
    %6 = vector.extract_strided_slice %5 {offsets = [32, 0], sizes = [32, 128], strides = [1, 1]} : vector<64x128xf32> to vector<32x128xf32>
    %cst_5 = arith.constant 0.000000e+00 : f32
    %7 = vector.broadcast %cst_5 : f32 to vector<32x128xf32>
    %8 = arith.maximumf %6, %7 : vector<32x128xf32>
    %9 = vector.extract_strided_slice %5 {offsets = [0, 0], sizes = [32, 128], strides = [1, 1]} : vector<64x128xf32> to vector<32x128xf32>
    %cst_6 = arith.constant dense<0.000000e+00> : vector<128xf32>
    %10 = vector.multi_reduction <add>, %9, %cst_6 [0] : vector<32x128xf32> to vector<128xf32>
    %11 = vector.shape_cast %10 : vector<128xf32> to vector<1x128xf32>
    %cst_7 = arith.constant 3.200000e+01 : f32
    %12 = vector.broadcast %cst_7 : f32 to vector<1x128xf32>
    %13 = arith.divf %11, %12 : vector<1x128xf32>
    %14 = arith.mulf %9, %9 : vector<32x128xf32>
    %cst_8 = arith.constant dense<0.000000e+00> : vector<128xf32>
    %15 = vector.multi_reduction <add>, %14, %cst_8 [0] : vector<32x128xf32> to vector<128xf32>
    %16 = vector.shape_cast %15 : vector<128xf32> to vector<1x128xf32>
    %cst_9 = arith.constant 3.200000e+01 : f32
    %17 = vector.broadcast %cst_9 : f32 to vector<1x128xf32>
    %18 = arith.divf %16, %17 : vector<1x128xf32>
    %19 = arith.mulf %13, %13 : vector<1x128xf32>
    %20 = arith.subf %18, %19 : vector<1x128xf32>
    %cst_10 = arith.constant 9.99999974E-6 : f32
    %21 = vector.broadcast %cst_10 : f32 to vector<1x128xf32>
    %22 = arith.addf %20, %21 : vector<1x128xf32>
    %23 = math.rsqrt %22 : vector<1x128xf32>
    %24 = vector.broadcast %13 : vector<1x128xf32> to vector<32x128xf32>
    %25 = arith.subf %9, %24 : vector<32x128xf32>
    %26 = vector.broadcast %23 : vector<1x128xf32> to vector<32x128xf32>
    %27 = arith.mulf %25, %26 : vector<32x128xf32>
    %c0_11 = arith.constant 0 : index
    %c0_12 = arith.constant 0 : index
    %28 = vector.load %arg4[%c0_11, %c0_12] : memref<32x1xf32, #tpu.memory_space<vmem>>, vector<32x1xf32>
    %29 = vector.broadcast %28 : vector<32x1xf32> to vector<32x128xf32>
    %30 = arith.mulf %27, %29 : vector<32x128xf32>
    %c0_13 = arith.constant 0 : index
    %c0_14 = arith.constant 0 : index
    %31 = vector.load %arg5[%c0_13, %c0_14] : memref<32x1xf32, #tpu.memory_space<vmem>>, vector<32x1xf32>
    %32 = vector.broadcast %31 : vector<32x1xf32> to vector<32x128xf32>
    %33 = arith.addf %30, %32 : vector<32x128xf32>
    %cst_15 = arith.constant 0.000000e+00 : f32
    %34 = vector.broadcast %cst_15 : f32 to vector<32x128xf32>
    %35 = arith.maximumf %33, %34 : vector<32x128xf32>
    %c0_16 = arith.constant 0 : index
    %c0_17 = arith.constant 0 : index
    %36 = vector.load %arg6[%c0_16, %c0_17] : memref<32x32xf32, #tpu.memory_space<vmem>>, vector<32x32xf32>
    %cst_18 = arith.constant dense<0.000000e+00> : vector<32x128xf32>
    %37 = tpu.matmul %36, %35, %cst_18 {dimension_numbers = #tpu.dot_dimension_numbers<[1], [0], [0], [1], [0, 0, 1, 1], [], []>} : vector<32x32xf32>, vector<32x128xf32>, vector<32x128xf32> -> vector<32x128xf32>
    %c0_19 = arith.constant 0 : index
    %c0_20 = arith.constant 0 : index
    %38 = vector.load %arg7[%c0_19, %c0_20] : memref<32x1xf32, #tpu.memory_space<vmem>>, vector<32x1xf32>
    %39 = vector.broadcast %38 : vector<32x1xf32> to vector<32x128xf32>
    %40 = arith.addf %37, %39 : vector<32x128xf32>
    %cst_21 = arith.constant dense<0.000000e+00> : vector<128xf32>
    %41 = vector.multi_reduction <add>, %40, %cst_21 [0] : vector<32x128xf32> to vector<128xf32>
    %42 = vector.shape_cast %41 : vector<128xf32> to vector<1x128xf32>
    %cst_22 = arith.constant 3.200000e+01 : f32
    %43 = vector.broadcast %cst_22 : f32 to vector<1x128xf32>
    %44 = arith.divf %42, %43 : vector<1x128xf32>
    %45 = arith.mulf %40, %40 : vector<32x128xf32>
    %cst_23 = arith.constant dense<0.000000e+00> : vector<128xf32>
    %46 = vector.multi_reduction <add>, %45, %cst_23 [0] : vector<32x128xf32> to vector<128xf32>
    %47 = vector.shape_cast %46 : vector<128xf32> to vector<1x128xf32>
    %cst_24 = arith.constant 3.200000e+01 : f32
    %48 = vector.broadcast %cst_24 : f32 to vector<1x128xf32>
    %49 = arith.divf %47, %48 : vector<1x128xf32>
    %50 = arith.mulf %44, %44 : vector<1x128xf32>
    %51 = arith.subf %49, %50 : vector<1x128xf32>
    %cst_25 = arith.constant 9.99999974E-6 : f32
    %52 = vector.broadcast %cst_25 : f32 to vector<1x128xf32>
    %53 = arith.addf %51, %52 : vector<1x128xf32>
    %54 = math.rsqrt %53 : vector<1x128xf32>
    %55 = vector.broadcast %44 : vector<1x128xf32> to vector<32x128xf32>
    %56 = arith.subf %40, %55 : vector<32x128xf32>
    %57 = vector.broadcast %54 : vector<1x128xf32> to vector<32x128xf32>
    %58 = arith.mulf %56, %57 : vector<32x128xf32>
    %c0_26 = arith.constant 0 : index
    %c0_27 = arith.constant 0 : index
    %59 = vector.load %arg8[%c0_26, %c0_27] : memref<32x1xf32, #tpu.memory_space<vmem>>, vector<32x1xf32>
    %60 = vector.broadcast %59 : vector<32x1xf32> to vector<32x128xf32>
    %61 = arith.mulf %58, %60 : vector<32x128xf32>
    %c0_28 = arith.constant 0 : index
    %c0_29 = arith.constant 0 : index
    %62 = vector.load %arg9[%c0_28, %c0_29] : memref<32x1xf32, #tpu.memory_space<vmem>>, vector<32x1xf32>
    %63 = vector.broadcast %62 : vector<32x1xf32> to vector<32x128xf32>
    %64 = arith.addf %61, %63 : vector<32x128xf32>
    %cst_30 = arith.constant 0.000000e+00 : f32
    %65 = vector.broadcast %cst_30 : f32 to vector<32x128xf32>
    %66 = arith.maximumf %64, %65 : vector<32x128xf32>
    %c0_31 = arith.constant 0 : index
    %c0_32 = arith.constant 0 : index
    %67 = vector.load %arg10[%c0_31, %c0_32] : memref<32x32xf32, #tpu.memory_space<vmem>>, vector<32x32xf32>
    %cst_33 = arith.constant dense<0.000000e+00> : vector<32x128xf32>
    %68 = tpu.matmul %67, %66, %cst_33 {dimension_numbers = #tpu.dot_dimension_numbers<[1], [0], [0], [1], [0, 0, 1, 1], [], []>} : vector<32x32xf32>, vector<32x128xf32>, vector<32x128xf32> -> vector<32x128xf32>
    %c0_34 = arith.constant 0 : index
    %c0_35 = arith.constant 0 : index
    %69 = vector.load %arg11[%c0_34, %c0_35] : memref<32x1xf32, #tpu.memory_space<vmem>>, vector<32x1xf32>
    %70 = vector.broadcast %69 : vector<32x1xf32> to vector<32x128xf32>
    %71 = arith.addf %68, %70 : vector<32x128xf32>
    %cst_36 = arith.constant dense<0.000000e+00> : vector<128xf32>
    %72 = vector.multi_reduction <add>, %71, %cst_36 [0] : vector<32x128xf32> to vector<128xf32>
    %73 = vector.shape_cast %72 : vector<128xf32> to vector<1x128xf32>
    %cst_37 = arith.constant 3.200000e+01 : f32
    %74 = vector.broadcast %cst_37 : f32 to vector<1x128xf32>
    %75 = arith.divf %73, %74 : vector<1x128xf32>
    %76 = arith.mulf %71, %71 : vector<32x128xf32>
    %cst_38 = arith.constant dense<0.000000e+00> : vector<128xf32>
    %77 = vector.multi_reduction <add>, %76, %cst_38 [0] : vector<32x128xf32> to vector<128xf32>
    %78 = vector.shape_cast %77 : vector<128xf32> to vector<1x128xf32>
    %cst_39 = arith.constant 3.200000e+01 : f32
    %79 = vector.broadcast %cst_39 : f32 to vector<1x128xf32>
    %80 = arith.divf %78, %79 : vector<1x128xf32>
    %81 = arith.mulf %75, %75 : vector<1x128xf32>
    %82 = arith.subf %80, %81 : vector<1x128xf32>
    %cst_40 = arith.constant 9.99999974E-6 : f32
    %83 = vector.broadcast %cst_40 : f32 to vector<1x128xf32>
    %84 = arith.addf %82, %83 : vector<1x128xf32>
    %85 = math.rsqrt %84 : vector<1x128xf32>
    %86 = vector.broadcast %75 : vector<1x128xf32> to vector<32x128xf32>
    %87 = arith.subf %71, %86 : vector<32x128xf32>
    %88 = vector.broadcast %85 : vector<1x128xf32> to vector<32x128xf32>
    %89 = arith.mulf %87, %88 : vector<32x128xf32>
    %c0_41 = arith.constant 0 : index
    %c0_42 = arith.constant 0 : index
    %90 = vector.load %arg12[%c0_41, %c0_42] : memref<32x1xf32, #tpu.memory_space<vmem>>, vector<32x1xf32>
    %91 = vector.broadcast %90 : vector<32x1xf32> to vector<32x128xf32>
    %92 = arith.mulf %89, %91 : vector<32x128xf32>
    %c0_43 = arith.constant 0 : index
    %c0_44 = arith.constant 0 : index
    %93 = vector.load %arg13[%c0_43, %c0_44] : memref<32x1xf32, #tpu.memory_space<vmem>>, vector<32x1xf32>
    %94 = vector.broadcast %93 : vector<32x1xf32> to vector<32x128xf32>
    %95 = arith.addf %92, %94 : vector<32x128xf32>
    %cst_45 = arith.constant 0.000000e+00 : f32
    %96 = vector.broadcast %cst_45 : f32 to vector<32x128xf32>
    %97 = arith.maximumf %95, %96 : vector<32x128xf32>
    %98 = arith.addf %97, %8 : vector<32x128xf32>
    %c0_46 = arith.constant 0 : index
    %c0_47 = arith.constant 0 : index
    %99 = vector.load %arg14[%c0_46, %c0_47] : memref<8x32xf32, #tpu.memory_space<vmem>>, vector<8x32xf32>
    %cst_48 = arith.constant dense<0.000000e+00> : vector<8x128xf32>
    %100 = tpu.matmul %99, %98, %cst_48 {dimension_numbers = #tpu.dot_dimension_numbers<[1], [0], [0], [1], [0, 0, 1, 1], [], []>} : vector<8x32xf32>, vector<32x128xf32>, vector<8x128xf32> -> vector<8x128xf32>
    %c0_49 = arith.constant 0 : index
    %c0_50 = arith.constant 0 : index
    %101 = vector.load %arg15[%c0_49, %c0_50] : memref<8x1xf32, #tpu.memory_space<vmem>>, vector<8x1xf32>
    %102 = vector.broadcast %101 : vector<8x1xf32> to vector<8x128xf32>
    %103 = arith.addf %100, %102 : vector<8x128xf32>
    %104 = math.tanh %103 : vector<8x128xf32>
    %c0_51 = arith.constant 0 : index
    %c0_52 = arith.constant 0 : index
    %105 = vector.load %arg16[%c0_51, %c0_52] : memref<8x128xf32, #tpu.memory_space<vmem>>, vector<8x128xf32>
    tpu.vector_store %arg16[%c0_51, %c0_52], %104 {strides = array<i32>} : memref<8x128xf32, #tpu.memory_space<vmem>>, vector<8x128xf32>,
    return
  }
  func.func @transform_0(%arg0: i32) -> (i32, i32) {
    %c0_i32 = arith.constant 0 : i32
    %c0_i32_0 = arith.constant 0 : i32
    return %c0_i32, %arg0 : i32, i32
  }
  func.func @transform_1(%arg0: i32) -> (i32, i32) {
    %c0_i32 = arith.constant 0 : i32
    %c0_i32_0 = arith.constant 0 : i32
    %c0_i32_1 = arith.constant 0 : i32
    return %c0_i32, %c0_i32_0 : i32, i32
  }
  func.func @transform_2(%arg0: i32) -> (i32, i32) {
    %c0_i32 = arith.constant 0 : i32
    %c0_i32_0 = arith.constant 0 : i32
    %c0_i32_1 = arith.constant 0 : i32
    return %c0_i32, %c0_i32_0 : i32, i32
  }
  func.func @transform_3(%arg0: i32) -> (i32, i32) {
    %c0_i32 = arith.constant 0 : i32
    %c0_i32_0 = arith.constant 0 : i32
    %c0_i32_1 = arith.constant 0 : i32
    return %c0_i32, %c0_i32_0 : i32, i32
  }
  func.func @transform_4(%arg0: i32) -> (i32, i32) {
    %c0_i32 = arith.constant 0 : i32
    %c0_i32_0 = arith.constant 0 : i32
    %c0_i32_1 = arith.constant 0 : i32
    return %c0_i32, %c0_i32_0 : i32, i32
  }
  func.func @transform_5(%arg0: i32) -> (i32, i32) {
    %c0_i32 = arith.constant 0 : i32
    %c0_i32_0 = arith.constant 0 : i32
    %c0_i32_1 = arith.constant 0 : i32
    return %c0_i32, %c0_i32_0 : i32, i32
  }
  func.func @transform_6(%arg0: i32) -> (i32, i32) {
    %c0_i32 = arith.constant 0 : i32
    %c0_i32_0 = arith.constant 0 : i32
    %c0_i32_1 = arith.constant 0 : i32
    return %c0_i32, %c0_i32_0 : i32, i32
  }
  func.func @transform_7(%arg0: i32) -> (i32, i32) {
    %c0_i32 = arith.constant 0 : i32
    %c0_i32_0 = arith.constant 0 : i32
    %c0_i32_1 = arith.constant 0 : i32
    return %c0_i32, %c0_i32_0 : i32, i32
  }
  func.func @transform_8(%arg0: i32) -> (i32, i32) {
    %c0_i32 = arith.constant 0 : i32
    %c0_i32_0 = arith.constant 0 : i32
    %c0_i32_1 = arith.constant 0 : i32
    return %c0_i32, %c0_i32_0 : i32, i32
  }
  func.func @transform_9(%arg0: i32) -> (i32, i32) {
    %c0_i32 = arith.constant 0 : i32
    %c0_i32_0 = arith.constant 0 : i32
    %c0_i32_1 = arith.constant 0 : i32
    return %c0_i32, %c0_i32_0 : i32, i32
  }
  func.func @transform_10(%arg0: i32) -> (i32, i32) {
    %c0_i32 = arith.constant 0 : i32
    %c0_i32_0 = arith.constant 0 : i32
    %c0_i32_1 = arith.constant 0 : i32
    return %c0_i32, %c0_i32_0 : i32, i32
  }
  func.func @transform_11(%arg0: i32) -> (i32, i32) {
    %c0_i32 = arith.constant 0 : i32
    %c0_i32_0 = arith.constant 0 : i32
    %c0_i32_1 = arith.constant 0 : i32
    return %c0_i32, %c0_i32_0 : i32, i32
  }
  func.func @transform_12(%arg0: i32) -> (i32, i32) {
    %c0_i32 = arith.constant 0 : i32
    %c0_i32_0 = arith.constant 0 : i32
    %c0_i32_1 = arith.constant 0 : i32
    return %c0_i32, %c0_i32_0 : i32, i32
  }
  func.func @transform_13(%arg0: i32) -> (i32, i32) {
    %c0_i32 = arith.constant 0 : i32
    %c0_i32_0 = arith.constant 0 : i32
    %c0_i32_1 = arith.constant 0 : i32
    return %c0_i32, %c0_i32_0 : i32, i32
  }
  func.func @transform_14(%arg0: i32) -> (i32, i32) {
    %c0_i32 = arith.constant 0 : i32
    %c0_i32_0 = arith.constant 0 : i32
    %c0_i32_1 = arith.constant 0 : i32
    return %c0_i32, %c0_i32_0 : i32, i32
  }
  func.func @transform_15(%arg0: i32) -> (i32, i32) {
    %c0_i32 = arith.constant 0 : i32
    %c0_i32_0 = arith.constant 0 : i32
    return %c0_i32, %arg0 : i32, i32
  }
}

</mosaic_0001>

<bundles_post_ra>
// kernel: tpu_custom_call.1
= control target key start
LH: loop header
LB: loop body
LE: loop exit
PB: predicated region body
PF: predicated region fallthrough
CT: control target
= control target key end

     0   :  { %vm109_vm0 = vcmask 130048   ;;  %v1051_v4 = vmov 0   ;;  %s1359_s0 = inlined_call_operand.vmem [shape: f32[16,128], index: 0, kind: input, shape index: {}]   ;;  %s1360_s1 = inlined_call_operand.vmem [shape: f32[64,16], index: 1, kind: input, shape index: {}]   ;;  %s1361_s2 = inlined_call_operand.vmem [shape: f32[64,1], index: 2, kind: input, shape index: {}]   ;;  %s1362_s3 = inlined_call_operand.vmem [shape: f32[32,1], index: 3, kind: input, shape index: {}]   ;;  %s1363_s4 = inlined_call_operand.vmem [shape: f32[32,1], index: 4, kind: input, shape index: {}]   ;;  %s1364_s5 = inlined_call_operand.vmem [shape: f32[32,32], index: 5, kind: input, shape index: {}]   ;;  %s1365_s6 = inlined_call_operand.vmem [shape: f32[32,1], index: 6, kind: input, shape index: {}]   ;;  %s1366_s7 = inlined_call_operand.vmem [shape: f32[32,1], index: 7, kind: input, shape index: {}]   ;;  %s1367_s8 = inlined_call_operand.vmem [shape: f32[32,1], index: 8, kind: input, shape index: {}]   ;;  %s1368_s9 = inlined_call_operand.vmem [shape: f32[32,32], index: 9, kind: input, shape index: {}]   ;;  %s1369_s10 = inlined_call_operand.vmem [shape: f32[32,1], index: 10, kind: input, shape index: {}]   ;;  %s1370_s11 = inlined_call_operand.vmem [shape: f32[32,1], index: 11, kind: input, shape index: {}]   ;;  %s1371_s12 = inlined_call_operand.vmem [shape: f32[32,1], index: 12, kind: input, shape index: {}]   ;;  %s1372_s13 = inlined_call_operand.vmem [shape: f32[8,32], index: 13, kind: input, shape index: {}]   ;;  %s1373_s14 = inlined_call_operand.vmem [shape: f32[8,1], index: 14, kind: input, shape index: {}]   ;;  %s1374_s15 = inlined_call_operand.hbm [shape: f32[8,128], index: 15, kind: output, shape index: {}]  }
   0x1   :  { %v51_v0 = vld [vmem:[%s1359_s0] sm:$0xff]  ;;  %v52_v1 = vld [vmem:[%s1359_s0 + $0x8] sm:$0xff]  ;;  %1017 = vset.pattern.permute.xlu0 %v1051_v4  ;;  %1018 = vset.pattern.permute.xlu1 %v1051_v4  ;;  %v63_v7 = vld [vmem:[%s1361_s2 + $0x10] sm:$0xff] }
   0x2   :  { %v53_v2 = vld [vmem:[%s1360_s1] sm:$0xff]  ;;  %v986_v3 = vpack.c.bf16 %v52_v1, %v51_v0  ;;  %v62_v6 = vld [vmem:[%s1361_s2 + $0x8] sm:$0xff]  ;;  %81 = vperm.xlu1 %1018, %v63_v7   ;;  %v55_v9 = vld [vmem:[%s1360_s1 + $0x10] sm:$0xff] }
   0x3   :  { %935 = vmatprep.mubr.msk.f32.mxu0 %vm109_vm0, %v53_v2  ;;  %v61_v5 = vld [vmem:[%s1361_s2] sm:$0xff]  ;;  %v54_v8 = vld [vmem:[%s1360_s1 + $0x8] sm:$0xff]  ;;  %v64_v10 = vld [vmem:[%s1361_s2 + $0x18] sm:$0xff] }
   0x4   :  { %71 = vperm.xlu0 %1017, %v61_v5   ;;  %987 = vmatprep.subr.bf16.mxu0 %v986_v3  ;;  %v280_v11 = vld [vmem:[%s1362_s3] sm:$0xff]  ;;  %v56_v12 = vld [vmem:[%s1360_s1 + $0x18] sm:$0xff]  ;;  %v281_v14 = vld [vmem:[%s1362_s3 + $0x8] sm:$0xff] }
   0x5   :  { %989 = vmatpush3.bf16.msra.mxu0 %v986_v3  ;;  %v57_v13 = vld [vmem:[%s1360_s1 + $0x20] sm:$0xff]  ;;  %v58_v16 = vld [vmem:[%s1360_s1 + $0x28] sm:$0xff]  ;;  %v59_v17 = vld [vmem:[%s1360_s1 + $0x30] sm:$0xff] }
   0x6   :  { %86 = vperm.xlu1 %1018, %v64_v10   ;;  %v308_v15 = vld [vmem:[%s1363_s4] sm:$0xff]  ;;  %v309_v18 = vld [vmem:[%s1363_s4 + $0x8] sm:$0xff]  ;;  %v282_v19 = vld [vmem:[%s1362_s3 + $0x10] sm:$0xff] }
   0x7   :  { %v60_v20 = vld [vmem:[%s1360_s1 + $0x38] sm:$0xff] }
   0x8   :  { %76 = vperm.xlu0 %1017, %v62_v6   ;;  %936 = vmatmul.mubr.msk.f32.vlgmr.msra.gmra.mrb[0].mxu0 %vm109_vm0, %v54_v8  ;;  %v283_v21 = vld [vmem:[%s1362_s3 + $0x18] sm:$0xff] }
   0x9   :  { %938 = vmatprep.mubr.msk.f32.mxu0 %vm109_vm0, %v55_v9 }
   0xa   :  { %291 = vperm.xlu1 %1018, %v281_v14  }
   0xc   :  { %286 = vperm.xlu0 %1017, %v280_v11   ;;  %939 = vmatmul.mubr.msk.f32.gmra.mrb[2].mxu0 %vm109_vm0, %v56_v12 }
   0xd   :  { %941 = vmatprep.mubr.msk.f32.mxu0 %vm109_vm0, %v57_v13 }
   0xe   :  { %319 = vperm.xlu1 %1018, %v309_v18  }
  0x10   :  { %314 = vperm.xlu0 %1017, %v308_v15   ;;  %942 = vmatmul.mubr.msk.f32.gmra.mrb[4].mxu0 %vm109_vm0, %v58_v16 }
  0x11   :  { %944 = vmatprep.mubr.msk.f32.mxu0 %vm109_vm0, %v59_v17 }
  0x12   :  { %20 = vsyncpa [#allocation3], 0  ;;  %v310_v22 = vld [vmem:[%s1363_s4 + $0x10] sm:$0xff]  ;;  %301 = vperm.xlu1 %1018, %v283_v21   ;;  %v311_v23 = vld [vmem:[%s1363_s4 + $0x18] sm:$0xff]  ;;  %vm368_vm1 = vcmask 261120   ;;  %vm1053_vm2 = vmmov 0  }
  0x13   :  { %v344_v24 = vld [vmem:[%s1365_s6] sm:$0xff]  ;;  %v345_v25 = vld [vmem:[%s1365_s6 + $0x8] sm:$0xff]  ;;  %v346_v26 = vld [vmem:[%s1365_s6 + $0x10] sm:$0xff]  ;;  %s1055_s16 = smov [#allocation2]  }
  0x14   :  { %296 = vperm.xlu0 %1017, %v282_v19   ;;  %945 = vmatmul.mubr.msk.f32.gmra.mrb[6].mxu0 %vm109_vm0, %v60_v20  ;;  %v347_v27 = vld [vmem:[%s1365_s6 + $0x18] sm:$0xff]  ;;  %v502_v28 = vld [vmem:[%s1366_s7] sm:$0xff]  ;;  %v503_v29 = vld [vmem:[%s1366_s7 + $0x8] sm:$0xff]  ;;  %s875_s17 = sshll.u32 %s1055_s16, 4  ;;  %s876_s17 = int_to_ptr.vmem [resolvable:$true] %s875_s17 }
  0x15   :  { %v530_v30 = vld [vmem:[%s1367_s8] sm:$0xff]  ;;  %v531_v31 = vld [vmem:[%s1367_s8 + $0x8] sm:$0xff]  ;;  %v504_v32 = vld [vmem:[%s1366_s7 + $0x10] sm:$0xff]  ;;  %s1027_s18 = scalar_lea.vmem %s876_s17, 128  ;;  %p1032_p1 = scmp.lt.s32.totalorder %s876_s17, %s876_s17 }
  0x16   :  { %329 = vperm.xlu1 %1018, %v311_v23   ;;  %v505_v33 = vld [vmem:[%s1366_s7 + $0x18] sm:$0xff]  ;;  %v532_v34 = vld [vmem:[%s1367_s8 + $0x10] sm:$0xff]  ;;  %v566_v36 = vld [vmem:[%s1369_s10] sm:$0xff]  ;;  %p1028_p0 = scmp.ne.s32.totalorder %s876_s17, %s1027_s18  ;;  %p1033_p2 = scmp.lt.s32.totalorder %s1027_s18, %s1027_s18 }
  0x17   :  { %v533_v35 = vld [vmem:[%s1367_s8 + $0x18] sm:$0xff]  ;;  %v567_v37 = vld [vmem:[%s1369_s10 + $0x8] sm:$0xff]  ;;  %v568_v38 = vld [vmem:[%s1369_s10 + $0x10] sm:$0xff] }
  0x18   :  { %324 = vperm.xlu0 %1017, %v310_v22   ;;  %v569_v39 = vld [vmem:[%s1369_s10 + $0x18] sm:$0xff]  ;;  %v723_v40 = vld [vmem:[%s1370_s11] sm:$0xff]  ;;  %v724_v41 = vld [vmem:[%s1370_s11 + $0x8] sm:$0xff]  ;;  %p1034_p3 = por %p1033_p2, %p1032_p1 }
  0x19   :  { %v65_v42 = vld [vmem:[%s1361_s2 + $0x20] sm:$0xff]  ;;  %v66_v43 = vld [vmem:[%s1361_s2 + $0x28] sm:$0xff]  ;;  %v725_v46 = vld [vmem:[%s1370_s11 + $0x10] sm:$0xff] }
  0x1a   :  { %355 = vperm.xlu1 %1018, %v345_v25   ;;  %v751_v44 = vld [vmem:[%s1371_s12] sm:$0xff]  ;;  %v752_v45 = vld [vmem:[%s1371_s12 + $0x8] sm:$0xff]  ;;  %v726_v47 = vld [vmem:[%s1370_s11 + $0x18] sm:$0xff]  ;;  %p1035_p4 = pnand %p1034_p3, %p1028_p0 }
  0x1b   :  { %v67_v48 = vld [vmem:[%s1361_s2 + $0x30] sm:$0xff]  ;;  %v68_v49 = vld [vmem:[%s1361_s2 + $0x38] sm:$0xff]  ;;  %v788_v52 = vld [vmem:[%s1373_s14] sm:$0xff] }
  0x1c   :  { %350 = vperm.xlu0 %1017, %v344_v24   ;;  %v753_v50 = vld [vmem:[%s1371_s12 + $0x10] sm:$0xff]  ;;  %v754_v51 = vld [vmem:[%s1371_s12 + $0x18] sm:$0xff]  ;;  %v340_v53 = vld [vmem:[%s1364_s5] sm:$0xff] }
  0x1d   :  { %955 = vmatprep.mubr.msk.f32.mxu1 %vm368_vm1, %v340_v53 }
  0x1e   :  { %365 = vperm.xlu1 %1018, %v347_v27  }
  0x20   :  { %360 = vperm.xlu0 %1017, %v346_v26  }
  0x22   :  { %513 = vperm.xlu1 %1018, %v503_v29  }
  0x24   :  { %508 = vperm.xlu0 %1017, %v502_v28  }
  0x26   :  { %541 = vperm.xlu1 %1018, %v531_v31  }
  0x28   :  { %536 = vperm.xlu0 %1017, %v530_v30  }
  0x2a   :  { %523 = vperm.xlu1 %1018, %v505_v33  }
  0x2c   :  { %518 = vperm.xlu0 %1017, %v504_v32  }
  0x2e   :  { %551 = vperm.xlu1 %1018, %v533_v35  }
  0x30   :  { %546 = vperm.xlu0 %1017, %v532_v34  }
  0x32   :  { %577 = vperm.xlu1 %1018, %v567_v37  }
  0x34   :  { %572 = vperm.xlu0 %1017, %v566_v36  }
  0x36   :  { %587 = vperm.xlu1 %1018, %v569_v39  }
  0x38   :  { %582 = vperm.xlu0 %1017, %v568_v38  }
  0x3a   :  { %734 = vperm.xlu1 %1018, %v724_v41  }
  0x3c   :  { %729 = vperm.xlu0 %1017, %v723_v40  }
  0x3e   :  { %96 = vperm.xlu1 %1018, %v66_v43  }
  0x40   :  { %91 = vperm.xlu0 %1017, %v65_v42  }
  0x42   :  { %762 = vperm.xlu1 %1018, %v752_v45  }
  0x44   :  { %757 = vperm.xlu0 %1017, %v751_v44  }
  0x46   :  { %744 = vperm.xlu1 %1018, %v726_v47  }
  0x48   :  { %739 = vperm.xlu0 %1017, %v725_v46  }
  0x4a   :  { %106 = vperm.xlu1 %1018, %v68_v49  }
  0x4c   :  { %101 = vperm.xlu0 %1017, %v67_v48  }
  0x4e   :  { %772 = vperm.xlu1 %1018, %v754_v51  }
  0x50   :  { %767 = vperm.xlu0 %1017, %v753_v50  }
  0x54   :  { %791 = vperm.xlu0 %1017, %v788_v52  }
  0x81   :  { %v82_v55 = vpop.permute.xlu1 %81 }
  0x83   :  { %v72_v54 = vpop.permute.xlu0 %71 }
  0x85   :  { %v87_v1 = vpop.permute.xlu1 %86 }
  0x87   :  { %v77_v56 = vpop.permute.xlu0 %76 }
  0x89   :  { %v292_v36 = vpop.permute.xlu1 %291 }
  0x8b   :  { %v287_v35 = vpop.permute.xlu0 %286 }
  0x8d   :  { %v320_v40 = vpop.permute.xlu1 %319 }
  0x8f   :  { %v315_v39 = vpop.permute.xlu0 %314 }
  0x91   :  { %v302_v42 = vpop.permute.xlu1 %301 }
  0x93   :  { %v297_v41 = vpop.permute.xlu0 %296 }
  0x95   :  { %v330_v53 = vpop.permute.xlu1 %329 }
  0x97   :  { %v325_v52 = vpop.permute.xlu0 %324 }
  0xdb   :  { %v937_v57 = vpop.f32.mrb[0].mxu0 }
  0xdc   :  { %v206_v58 = vadd.f32 %v937_v57, %v77_v56  ;;  %v200_v59 = vpop.f32.mrb[1].mxu0 }
  0xdd   :  { %v201_v60 = vadd.f32 %v200_v59, %v72_v54 }
  0xde   :  { %v255_v61 = vmul.f32 %v206_v58, %v206_v58 }
  0xdf   :  { %v243_v62 = vadd.f32 %v206_v58, %v201_v60  ;;  %v254_v63 = vmul.f32 %v201_v60, %v201_v60  ;;  %v940_v0 = vpop.f32.mrb[2].mxu0 }
  0xe0   :  { %v210_v2 = vpop.f32.mrb[3].mxu0  ;;  %v216_v4 = vadd.f32 %v940_v0, %v87_v1  ;;  %v341_v0 = vld [vmem:[%s1364_s5 + $0x8] sm:$0xff]  ;;  %v342_v1 = vld [vmem:[%s1364_s5 + $0x10] sm:$0xff] }
  0xe1   :  { %v258_v3 = vadd.f32 %v255_v61, %v254_v63  ;;  %v211_v5 = vadd.f32 %v210_v2, %v82_v55  ;;  %v343_v2 = vld [vmem:[%s1364_s5 + $0x18] sm:$0xff] }
  0xe2   :  { %v257_v10 = vmul.f32 %v216_v4, %v216_v4 }
  0xe3   :  { %v244_v6 = vadd.f32 %v243_v62, %v211_v5  ;;  %v256_v7 = vmul.f32 %v211_v5, %v211_v5  ;;  %v1301_v8 = vpop.f32.mrb[4].mxu0 }
  0xe4   :  { %v1303_v9 = vpop.f32.mrb[5].mxu0 }
  0xe5   :  { %v245_v11 = vadd.f32 %v244_v6, %v216_v4  ;;  %v259_v12 = vadd.f32 %v258_v3, %v256_v7  ;;  %v562_v3 = vld [vmem:[%s1368_s9] sm:$0xff] }
  0xe7   :  { %v246_v13 = vrot.slane %v245_v11, 4  ;;  %v260_v14 = vadd.f32 %v259_v12, %v257_v10  ;;  %v1305_v15 = vpop.f32.mrb[6].mxu0 }
  0xe8   :  { %v1307_v16 = vpop.f32.mrb[7].mxu0 }
  0xe9   :  { %v247_v17 = vadd.f32 %v246_v13, %v245_v11  ;;  %v261_v18 = vrot.slane %v260_v14, 4 }
  0xeb   :  { %v248_v19 = vrot.slane %v247_v17, 2  ;;  %v262_v20 = vadd.f32 %v261_v18, %v260_v14 }
  0xed   :  { %v249_v21 = vadd.f32 %v248_v19, %v247_v17  ;;  %v263_v22 = vrot.slane %v262_v20, 2 }
  0xef   :  { %v250_v23 = vrot.slane %v249_v21, 1  ;;  %v264_v24 = vadd.f32 %v263_v22, %v262_v20 }
  0xf1   :  { %v251_v25 = vadd.f32 %v250_v23, %v249_v21  ;;  %v265_v26 = vrot.slane %v264_v24, 1 }
  0xf3   :  { %v253_v27 = vmul.f32 0.03125, %v251_v25  ;;  %v266_v28 = vadd.f32 %v265_v26, %v264_v24 }
  0xf5   :  { %v267_v29 = vmul.f32 0.03125, %v266_v28  ;;  %v268_v30 = vmul.f32 %v253_v27, %v253_v27  ;;  %v274_v31 = vsub.f32 %v211_v5, %v253_v27  ;;  %v272_v32 = vsub.f32 %v201_v60, %v253_v27  ;;  %v356_v5 = vpop.permute.xlu1 %355 }
  0xf6   :  { %v273_v33 = vsub.f32 %v206_v58, %v253_v27  ;;  %v275_v34 = vsub.f32 %v216_v4, %v253_v27  ;;  %v351_v4 = vpop.permute.xlu0 %350 }
  0xf7   :  { %v269_v37 = vsub.f32 %v267_v29, %v268_v30 }
  0xf9   :  { %v270_v38 = vadd.f32 1e-05, %v269_v37  ;;  %v366_v19 = vpop.permute.xlu1 %365 }
  0xfa   :  { %v361_v13 = vpop.permute.xlu0 %360 }
  0xfb   :  { %1019 = vrsqrt.f32 %v270_v38 }
 0x105   :  { %v1020_v43 = vpop.eup %1019 }
 0x106   :  { %v278_v44 = vmul.f32 %v1020_v43, %v274_v31  ;;  %v276_v45 = vmul.f32 %v1020_v43, %v272_v32  ;;  %v277_v46 = vmul.f32 %v1020_v43, %v273_v33  ;;  %v279_v47 = vmul.f32 %v1020_v43, %v275_v34 }
 0x108   :  { %v304_v48 = vmul.f32 %v287_v35, %v276_v45  ;;  %v305_v49 = vmul.f32 %v292_v36, %v277_v46  ;;  %v306_v50 = vmul.f32 %v297_v41, %v278_v44  ;;  %v307_v51 = vmul.f32 %v302_v42, %v279_v47 }
 0x10a   :  { %v332_v54 = vadd.f32 %v315_v39, %v304_v48  ;;  %v333_v55 = vadd.f32 %v320_v40, %v305_v49  ;;  %v334_v56 = vadd.f32 %v325_v52, %v306_v50  ;;  %v335_v57 = vadd.f32 %v330_v53, %v307_v51  ;;  %v509_v49 = vpop.permute.xlu0 %508  ;;  %v514_v50 = vpop.permute.xlu1 %513 }
 0x10c   :  { %v336_v58 = vmax.f32 %v332_v54, 0.0  ;;  %v337_v59 = vmax.f32 %v333_v55, 0.0  ;;  %v338_v60 = vmax.f32 %v334_v56, 0.0  ;;  %v339_v61 = vmax.f32 %v335_v57, 0.0 }
 0x10e   :  { %v990_v62 = vpack.c.bf16 %v337_v59, %v336_v58  ;;  %v994_v63 = vpack.c.bf16 %v339_v61, %v338_v60  ;;  %v537_v53 = vpop.permute.xlu0 %536  ;;  %v542_v54 = vpop.permute.xlu1 %541 }
 0x110   :  { %991 = vmatprep.subr.bf16.mxu1 %v990_v62 }
 0x111   :  { %993 = vmatpush3.bf16.msra.mxu1 %v990_v62 }
 0x112   :  { %995 = vmatprep.subr.bf16.mxu1 %v994_v63  ;;  %v519_v55 = vpop.permute.xlu0 %518  ;;  %v524_v56 = vpop.permute.xlu1 %523 }
 0x115   :  { %997 = vmatpush3.bf16.msra.mxu1 %v994_v63 }
 0x118   :  { %956 = vmatmul.mubr.msk.f32.vlgmr.msra.gmra.mrb[0].mxu1 %vm368_vm1, %v341_v0 }
 0x119   :  { %958 = vmatprep.mubr.msk.f32.mxu1 %vm368_vm1, %v342_v1 }
 0x11c   :  { %959 = vmatmul.mubr.msk.f32.gmra.mrb[2].mxu1 %vm368_vm1, %v343_v2  ;;  %v547_v2 = vpop.permute.xlu0 %546 }
 0x11d   :  { %969 = vmatprep.mubr.msk.f32.mxu1 %vm368_vm1, %v562_v3  ;;  %v552_v3 = vpop.permute.xlu1 %551 }
 0x1eb   :  { %v957_v6 = vpop.f32.mrb[0].mxu1 }
 0x1ec   :  { %v453_v7 = vadd.f32 %v957_v6, %v356_v5  ;;  %v447_v10 = vpop.f32.mrb[1].mxu1 }
 0x1ed   :  { %v448_v11 = vadd.f32 %v447_v10, %v351_v4 }
 0x1ee   :  { %v477_v12 = vmul.f32 %v453_v7, %v453_v7 }
 0x1ef   :  { %v466_v14 = vadd.f32 %v453_v7, %v448_v11  ;;  %v476_v17 = vmul.f32 %v448_v11, %v448_v11  ;;  %v960_v18 = vpop.f32.mrb[2].mxu1 }
 0x1f0   :  { %v457_v20 = vpop.f32.mrb[3].mxu1  ;;  %v463_v22 = vadd.f32 %v960_v18, %v366_v19  ;;  %v563_v18 = vld [vmem:[%s1368_s9 + $0x8] sm:$0xff]  ;;  %v564_v19 = vld [vmem:[%s1368_s9 + $0x10] sm:$0xff] }
 0x1f1   :  { %v480_v21 = vadd.f32 %v477_v12, %v476_v17  ;;  %v458_v23 = vadd.f32 %v457_v20, %v361_v13  ;;  %v565_v20 = vld [vmem:[%s1368_s9 + $0x18] sm:$0xff] }
 0x1f2   :  { %v479_v26 = vmul.f32 %v463_v22, %v463_v22 }
 0x1f3   :  { %v467_v24 = vadd.f32 %v466_v14, %v458_v23  ;;  %v478_v25 = vmul.f32 %v458_v23, %v458_v23 }
 0x1f5   :  { %v468_v27 = vadd.f32 %v467_v24, %v463_v22  ;;  %v481_v28 = vadd.f32 %v480_v21, %v478_v25  ;;  %v1052_v21 = vmov 0.0|0.0   ;;  %v578_v24 = vpop.permute.xlu1 %577 }
 0x1f6   :  { %1006 = vmatprep.subr.bf16.mxu0 %v1052_v21 }
 0x1f7   :  { %v469_v29 = vrot.slane %v468_v27, 4  ;;  %v482_v30 = vadd.f32 %v481_v28, %v479_v26 }
 0x1f9   :  { %v470_v31 = vadd.f32 %v469_v29, %v468_v27  ;;  %v483_v32 = vrot.slane %v482_v30, 4 }
 0x1fb   :  { %v471_v33 = vrot.slane %v470_v31, 2  ;;  %v484_v34 = vadd.f32 %v483_v32, %v482_v30 }
 0x1fd   :  { %v472_v35 = vadd.f32 %v471_v33, %v470_v31  ;;  %v485_v36 = vrot.slane %v484_v34, 2 }
 0x1ff   :  { %v473_v37 = vrot.slane %v472_v35, 1  ;;  %v486_v38 = vadd.f32 %v485_v36, %v484_v34  ;;  %v588_v34 = vpop.permute.xlu1 %587 }
 0x201   :  { %v474_v39 = vadd.f32 %v473_v37, %v472_v35  ;;  %v487_v40 = vrot.slane %v486_v38, 1 }
 0x203   :  { %v475_v41 = vmul.f32 0.03125, %v474_v39  ;;  %v488_v42 = vadd.f32 %v487_v40, %v486_v38 }
 0x205   :  { %v489_v43 = vmul.f32 0.03125, %v488_v42  ;;  %v490_v44 = vmul.f32 %v475_v41, %v475_v41  ;;  %v496_v45 = vsub.f32 %v458_v23, %v475_v41  ;;  %v494_v46 = vsub.f32 %v448_v11, %v475_v41  ;;  %v573_v23 = vpop.permute.xlu0 %572 }
 0x206   :  { %v495_v47 = vsub.f32 %v453_v7, %v475_v41  ;;  %v497_v48 = vsub.f32 %v463_v22, %v475_v41  ;;  %v1054_v22 = vmov 0.0  }
 0x207   :  { %v491_v51 = vsub.f32 %v489_v43, %v490_v44  ;;  %983 = vmatprep.mubr.msk.f32.mxu0 %vm1053_vm2, %v1054_v22 }
 0x209   :  { %v492_v52 = vadd.f32 1e-05, %v491_v51  ;;  %v583_v30 = vpop.permute.xlu0 %582 }
 0x20b   :  { %1021 = vrsqrt.f32 %v492_v52 }
 0x215   :  { %v1022_v57 = vpop.eup %1021 }
 0x216   :  { %v500_v58 = vmul.f32 %v1022_v57, %v496_v45  ;;  %v498_v59 = vmul.f32 %v1022_v57, %v494_v46  ;;  %v499_v60 = vmul.f32 %v1022_v57, %v495_v47  ;;  %v501_v61 = vmul.f32 %v1022_v57, %v497_v48  ;;  %v730_v48 = vpop.permute.xlu0 %729 }
 0x218   :  { %v526_v62 = vmul.f32 %v509_v49, %v498_v59  ;;  %v527_v63 = vmul.f32 %v514_v50, %v499_v60  ;;  %v528_v0 = vmul.f32 %v519_v55, %v500_v58  ;;  %v529_v1 = vmul.f32 %v524_v56, %v501_v61  ;;  %v735_v49 = vpop.permute.xlu1 %734 }
 0x21a   :  { %v554_v4 = vadd.f32 %v537_v53, %v526_v62  ;;  %v555_v5 = vadd.f32 %v542_v54, %v527_v63  ;;  %v556_v6 = vadd.f32 %v547_v2, %v528_v0  ;;  %v557_v7 = vadd.f32 %v552_v3, %v529_v1  ;;  %v92_v56 = vpop.permute.xlu0 %91 }
 0x21c   :  { %v558_v10 = vmax.f32 %v554_v4, 0.0  ;;  %v559_v11 = vmax.f32 %v555_v5, 0.0  ;;  %v560_v12 = vmax.f32 %v556_v6, 0.0  ;;  %v561_v13 = vmax.f32 %v557_v7, 0.0  ;;  %v97_v57 = vpop.permute.xlu1 %96 }
 0x21d   :  { %v226_v22 = vadd.f32 %v1301_v8, %v97_v57 }
 0x21e   :  { %v998_v14 = vpack.c.bf16 %v559_v11, %v558_v10  ;;  %v1002_v17 = vpack.c.bf16 %v561_v13, %v560_v12  ;;  %v758_v4 = vpop.permute.xlu0 %757 }
 0x220   :  { %999 = vmatprep.subr.bf16.mxu1 %v998_v14  ;;  %v763_v5 = vpop.permute.xlu1 %762 }
 0x221   :  { %1001 = vmatpush3.bf16.msra.mxu1 %v998_v14 }
 0x222   :  { %1003 = vmatprep.subr.bf16.mxu1 %v1002_v17  ;;  %v740_v10 = vpop.permute.xlu0 %739 }
 0x224   :  { %v745_v11 = vpop.permute.xlu1 %744 }
 0x225   :  { %1005 = vmatpush3.bf16.msra.mxu1 %v1002_v17 }
 0x226   :  { %v102_v12 = vpop.permute.xlu0 %101 }
 0x228   :  { %970 = vmatmul.mubr.msk.f32.vlgmr.msra.gmra.mrb[4].mxu1 %vm368_vm1, %v563_v18  ;;  %v107_v13 = vpop.permute.xlu1 %106 }
 0x229   :  { %972 = vmatprep.mubr.msk.f32.mxu1 %vm368_vm1, %v564_v19 }
 0x22c   :  { %973 = vmatmul.mubr.msk.f32.gmra.mrb[6].mxu1 %vm368_vm1, %v565_v20 }
 0x2fb   :  { %v971_v25 = vpop.f32.mrb[4].mxu1 }
 0x2fc   :  { %v674_v26 = vadd.f32 %v971_v25, %v578_v24  ;;  %v668_v27 = vpop.f32.mrb[5].mxu1  ;;  %v236_v24 = vadd.f32 %v1305_v15, %v107_v13  ;;  %v231_v25 = vadd.f32 %v1307_v16, %v102_v12 }
 0x2fd   :  { %v669_v28 = vadd.f32 %v668_v27, %v573_v23  ;;  %v221_v23 = vadd.f32 %v1303_v9, %v92_v56 }
 0x2fe   :  { %v698_v29 = vmul.f32 %v674_v26, %v674_v26  ;;  %v241_v8 = vmax.f32 %v231_v25, 0.0 }
 0x2ff   :  { %v687_v31 = vadd.f32 %v674_v26, %v669_v28  ;;  %v697_v32 = vmul.f32 %v669_v28, %v669_v28  ;;  %v974_v33 = vpop.f32.mrb[6].mxu1 }
 0x300   :  { %v678_v35 = vpop.f32.mrb[7].mxu1  ;;  %v684_v37 = vadd.f32 %v974_v33, %v588_v34 }
 0x301   :  { %v701_v36 = vadd.f32 %v698_v29, %v697_v32  ;;  %v679_v38 = vadd.f32 %v678_v35, %v583_v30  ;;  %v768_v30 = vpop.permute.xlu0 %767 }
 0x302   :  { %v700_v41 = vmul.f32 %v684_v37, %v684_v37 }
 0x303   :  { %v688_v39 = vadd.f32 %v687_v31, %v679_v38  ;;  %v699_v40 = vmul.f32 %v679_v38, %v679_v38  ;;  %v773_v31 = vpop.permute.xlu1 %772 }
 0x305   :  { %v689_v42 = vadd.f32 %v688_v39, %v684_v37  ;;  %v702_v43 = vadd.f32 %v701_v36, %v699_v40  ;;  %v240_v36 = vmax.f32 %v226_v22, 0.0 }
 0x307   :  { %v690_v44 = vrot.slane %v689_v42, 4  ;;  %v703_v45 = vadd.f32 %v702_v43, %v700_v41 }
 0x309   :  { %v691_v46 = vadd.f32 %v690_v44, %v689_v42  ;;  %v704_v47 = vrot.slane %v703_v45, 4 }
 0x30b   :  { %v692_v50 = vrot.slane %v691_v46, 2  ;;  %v705_v51 = vadd.f32 %v704_v47, %v703_v45  ;;  %v792_v47 = vpop.permute.xlu0 %791 }
 0x30d   :  { %v693_v52 = vadd.f32 %v692_v50, %v691_v46  ;;  %v706_v53 = vrot.slane %v705_v51, 2  ;;  %v787_v46 = vld [vmem:[%s1372_s13] sm:$0xff] }
 0x30f   :  { %v694_v54 = vrot.slane %v693_v52, 1  ;;  %v707_v55 = vadd.f32 %v706_v53, %v705_v51 }
 0x311   :  { %v695_v58 = vadd.f32 %v694_v54, %v693_v52  ;;  %v708_v59 = vrot.slane %v707_v55, 1 }
 0x313   :  { %v696_v60 = vmul.f32 0.03125, %v695_v58  ;;  %v709_v61 = vadd.f32 %v708_v59, %v707_v55 }
 0x315   :  { %v710_v62 = vmul.f32 0.03125, %v709_v61  ;;  %v711_v63 = vmul.f32 %v696_v60, %v696_v60  ;;  %v717_v0 = vsub.f32 %v679_v38, %v696_v60  ;;  %v715_v1 = vsub.f32 %v669_v28, %v696_v60 }
 0x316   :  { %v716_v2 = vsub.f32 %v674_v26, %v696_v60  ;;  %v718_v3 = vsub.f32 %v684_v37, %v696_v60  ;;  %v239_v37 = vmax.f32 %v221_v23, 0.0  ;;  %v242_v38 = vmax.f32 %v236_v24, 0.0 }
 0x317   :  { %v712_v6 = vsub.f32 %v710_v62, %v711_v63 }
 0x319   :  { %v713_v7 = vadd.f32 1e-05, %v712_v6 }
 0x31b   :  { %1023 = vrsqrt.f32 %v713_v7 }
 0x325   :  { %v1024_v14 = vpop.eup %1023 }
 0x326   :  { %v721_v17 = vmul.f32 %v1024_v14, %v717_v0  ;;  %v719_v18 = vmul.f32 %v1024_v14, %v715_v1  ;;  %v720_v19 = vmul.f32 %v1024_v14, %v716_v2  ;;  %v722_v20 = vmul.f32 %v1024_v14, %v718_v3 }
 0x328   :  { %v749_v26 = vmul.f32 %v740_v10, %v721_v17  ;;  %v747_v27 = vmul.f32 %v730_v48, %v719_v18  ;;  %v748_v28 = vmul.f32 %v735_v49, %v720_v19  ;;  %v750_v29 = vmul.f32 %v745_v11, %v722_v20 }
 0x32a   :  { %v777_v32 = vadd.f32 %v768_v30, %v749_v26  ;;  %v775_v33 = vadd.f32 %v758_v4, %v747_v27  ;;  %v776_v34 = vadd.f32 %v763_v5, %v748_v28  ;;  %v778_v35 = vadd.f32 %v773_v31, %v750_v29 }
 0x32c   :  { %v779_v39 = vmax.f32 %v775_v33, 0.0  ;;  %v780_v9 = vmax.f32 %v776_v34, 0.0  ;;  %v781_v40 = vmax.f32 %v777_v32, 0.0  ;;  %v782_v15 = vmax.f32 %v778_v35, 0.0 }
 0x32e   :  { %v783_v41 = vadd.f32 %v779_v39, %v239_v37  ;;  %v784_v16 = vadd.f32 %v780_v9, %v240_v36  ;;  %v785_v42 = vadd.f32 %v781_v40, %v241_v8  ;;  %v786_v43 = vadd.f32 %v782_v15, %v242_v38 }
 0x330   :  { %v1007_v44 = vpack.c.bf16 %v784_v16, %v783_v41  ;;  %v1010_v45 = vpack.c.bf16 %v786_v43, %v785_v42 }
 0x332   :  { %1008 = vmatpush3.bf16.msra.mxu0 %v1007_v44 }
 0x333   :  { %1009 = vmatprep.subr.bf16.mxu0 %v1052_v21 }
 0x336   :  { %1011 = vmatpush3.bf16.msra.mxu0 %v1010_v45 }
 0x339   :  { %984 = vmatmul.mubr.msk.f32.vlgmr.msra.gmra.mrb[8].mxu0 %vm368_vm1, %v787_v46 }
 0x40c   :  { %v863_v48 = vpop.f32.mrb[8].mxu0 }
 0x40d   :  { %v864_v49 = vadd.f32 %v863_v48, %v792_v47  ;;  %v985_v50 = vpop.f32.mrb[9].mxu0 }
 0x40f   :  { %1025 = vtanh.f32 %v864_v49 }
 0x419   :  { %v1026_v51 = vpop.eup %1025 }
 0x41a   :  { %868 = vst [vmem:[#allocation2] sm:$0xff] %v1026_v51 }
 0x41b   :  { %1038 = shalt.err (!%p1035_p4)
}
 0x41c   :  { %s1039_s7 = scalar_lea.hbm %s1374_s15, 128 }
 0x41d   :  { %p1040_p5 = scmp.ne.s32.totalorder %s1374_s15, %s1039_s7  ;;  %p1043_p6 = scmp.lt.u32.totalorder %s1039_s7, %s1374_s15 }
 0x41f   :  { %p1045_p7 = pnand %p1043_p6, %p1040_p5 }
 0x421   :  { %1048 = shalt.err (!%p1045_p7)
}
 0x422   :  { %878 = dma.vmem_to_hbm [thread:$0]  %s876_s17, 128, %s1374_s15, [#allocation3]  }
 0x423   :  { %1049 = dma.done.wait [#allocation3], 128  }
 0x424   :  { %1050 = vsyncadd [#allocation3], 4294967168 }
 0x425   :  { %882 = vsyncpa [#allocation3], 1 }

</bundles_post_ra>
